<compile_context>
chip_gen: v7x
topology: tpu7x:2x2x1
jax: 0.10.0
libtpu: 0.0.40
codegen_flags: <defaults>
</compile_context>

<pallas_src>
import jax
import jax.numpy as jnp
from jax import lax
from jax.experimental import pallas as pl
from jax.experimental.pallas import tpu as pltpu

_LANES = 128
_ALPHA = 0.2  # LeakyReLU negative slope


def _round_up(x, m):
    return (x + m - 1) // m * m


# ----------------------------------------------------------------------------
# Packing helpers (plain JAX, run once in the wrapper)
# ----------------------------------------------------------------------------
def _pack_weight(w, c_pad_in, c_pad_out):
    """PyTorch (C_out, C_in, K) -> (K, c_pad_in, c_pad_out) bf16 with zero lane pad."""
    c_out, c_in, K = w.shape
    wk = jnp.transpose(w, (2, 1, 0)).astype(jnp.float32)       # (K, C_in, C_out)
    out = jnp.zeros((K, c_pad_in, c_pad_out), jnp.float32)
    out = out.at[:, :c_in, :c_out].set(wk)
    return out.astype(jnp.bfloat16)


def _pack_bias(b, c_pad_out):
    out = jnp.zeros((1, c_pad_out), jnp.float32)
    return out.at[0, : b.shape[0]].set(b.astype(jnp.float32))


# ----------------------------------------------------------------------------
# Fused Pallas kernel: all conv layers in one body, activations stay in VMEM
# ----------------------------------------------------------------------------
def _make_fused_kernel(cfgs, alpha):
    n_layers = len(cfgs)

    def kernel(*refs):
        x_ref = refs[0]
        o_ref = refs[1 + 2 * n_layers]
        scratch_refs = refs[2 + 2 * n_layers:]

        h = x_ref[0]                                 # (T0, C_pad0) f32, lane-dense
        s_idx = 0
        for li, cfg in enumerate(cfgs):
            w_ref = refs[1 + 2 * li]                 # (K, C_pad_in, C_pad_out) bf16
            b_ref = refs[2 + 2 * li]                 # (1, C_pad_out) f32
            K, stride, pad = cfg["K"], cfg["stride"], cfg["padding"]
            T_in, T_out = cfg["T_in"], cfg["T_out"]

            if cfg["pointwise"]:
                acc = jnp.dot(h.astype(jnp.bfloat16), w_ref[0],
                              preferred_element_type=jnp.float32)
            else:
                buf = scratch_refs[s_idx]            # (T_in + 2*pad, C_pad_in) f32
                s_idx += 1
                Tpad, Cp = buf.shape
                # zero the halo rows, stage the layer input in VMEM
                if pad > 0:
                    buf[0:pad, :] = jnp.zeros((pad, Cp), jnp.float32)
                tail = Tpad - pad - T_in
                if tail > 0:
                    buf[pad + T_in:, :] = jnp.zeros((tail, Cp), jnp.float32)
                buf[pad:pad + T_in, :] = h

                acc = None
                for k in range(K):                   # fused tap-extract + accumulate
                    tap = buf[pl.ds(k, T_out, stride), :]      # strided halo read
                    yk = jnp.dot(tap.astype(jnp.bfloat16), w_ref[k],
                                 preferred_element_type=jnp.float32)
                    acc = yk if acc is None else acc + yk

            y = acc + b_ref[...]
            if cfg["activate"]:
                y = jnp.where(y > 0, y, alpha * y)
            h = y

        o_ref[0] = h.astype(o_ref.dtype)

    return kernel


# ----------------------------------------------------------------------------
# MotionEncoder forward
# ----------------------------------------------------------------------------
def init_motion_encoder_params(key, channels, output_size, vae_encoder=False):
    """Deterministic parameter init matching the PyTorch module's layer shapes."""
    params = []
    n_down = len(channels) - 1
    for i in range(1, n_down + 1):
        key, kw, kb = jax.random.split(key, 3)
        c_in, c_out = channels[i - 1], channels[i]
        params.append(dict(
            w=0.2 * jax.random.normal(kw, (c_out, c_in, 3), jnp.float32),
            b=0.1 * jax.random.normal(kb, (c_out,), jnp.float32),
            stride=2, padding=1, activate=True,
        ))
    key, kw, kb = jax.random.split(key, 3)
    c_out = output_size * 2 if vae_encoder else output_size
    params.append(dict(
        w=0.2 * jax.random.normal(kw, (c_out, channels[-1], 1), jnp.float32),
        b=0.1 * jax.random.normal(kb, (c_out,), jnp.float32),
        stride=1, padding=0, activate=False,
    ))
    return params


def reparametrize(mu, logvar, key):
    s_var = jnp.exp(0.5 * logvar)
    eps = jax.random.normal(key, mu.shape, mu.dtype)
    return eps * s_var + mu


def motion_encoder_forward(x_nct, params, vae_encoder=False, rng=None):
    """x_nct: (N, C, T) like the PyTorch module. Returns (output, mean, logvar)."""
    N, C0, T0 = x_nct.shape

    # ---- static layer geometry ----
    chans, times, cfgs = [C0], [T0], []
    for p in params:
        c_out, c_in, K = p["w"].shape
        assert c_in == chans[-1]
        stride, padding = p["stride"], p["padding"]
        t_out = (times[-1] + 2 * padding - K) // stride + 1
        cfgs.append(dict(
            K=K, stride=stride, padding=padding, activate=p["activate"],
            pointwise=(K == 1 and stride == 1 and padding == 0),
            T_in=times[-1], T_out=t_out, C_in=c_in, C_out=c_out,
            C_pad_in=_round_up(c_in, _LANES), C_pad_out=_round_up(c_out, _LANES)))
        chans.append(c_out)
        times.append(t_out)

    C_pad0 = cfgs[0]["C_pad_in"]
    C_pad_last = cfgs[-1]["C_pad_out"]
    T_last, C_last = times[-1], chans[-1]

    # ---- lane-dense (N, T, C_pad) channels-last input (cheap XLA plumbing) ----
    x = jnp.transpose(x_nct, (0, 2, 1)).astype(jnp.float32)     # (N, T0, C0)
    x = jnp.pad(x, ((0, 0), (0, 0), (0, C_pad0 - C0)))          # (N, T0, C_pad0)

    # ---- operands + specs ----
    operands = [x]
    in_specs = [pl.BlockSpec((1, T0, C_pad0), lambda n: (n, 0, 0))]
    scratch_shapes = []
    for p, cfg in zip(params, cfgs):
        W = _pack_weight(p["w"], cfg["C_pad_in"], cfg["C_pad_out"])
        b = _pack_bias(p["b"], cfg["C_pad_out"])
        operands += [W, b]
        # constants never change block index -> single-buffer them
        in_specs += [
            pl.BlockSpec(W.shape, lambda n: (0, 0, 0), pipeline_mode=pl.Buffered(1)),
            pl.BlockSpec(b.shape, lambda n: (0, 0), pipeline_mode=pl.Buffered(1)),
        ]
        if not cfg["pointwise"]:
            scratch_shapes.append(
                pltpu.VMEM((cfg["T_in"] + 2 * cfg["padding"], cfg["C_pad_in"]),
                           jnp.float32))

    kernel = _make_fused_kernel(cfgs, _ALPHA)

    out3d = pl.pallas_call(
        kernel,
        out_shape=jax.ShapeDtypeStruct((N, T_last, C_pad_last), jnp.float32),
        grid=(N,),
        in_specs=in_specs,
        out_specs=pl.BlockSpec((1, T_last, C_pad_last), lambda n: (n, 0, 0)),
        scratch_shapes=scratch_shapes,
        compiler_params=pltpu.CompilerParams(
            dimension_semantics=("parallel",),
            vmem_limit_bytes=48 * 1024 * 1024),
    )(*operands)

    # drop lane padding, back to PyTorch NCW layout
    out = jnp.transpose(out3d[..., :C_last], (0, 2, 1))          # (N, C_last, T_last)

    if vae_encoder:
        mean, logvar = jnp.split(out, 2, axis=1)
        if rng is None:          # guard: never crash if caller forgets the key
            rng = jax.random.PRNGKey(0)
        return reparametrize(mean, logvar, rng), mean, logvar
    return out, None, None


# ----------------------------------------------------------------------------
# Pure-JAX reference (lax conv) for correctness check
# ----------------------------------------------------------------------------
def _reference_forward(x_nct, params):
    h = x_nct.astype(jnp.float32)
    for p in params:
        h = lax.conv_general_dilated(
            h, p["w"].astype(jnp.float32),
            window_strides=(p["stride"],),
            padding=[(p["padding"], p["padding"])],
            dimension_numbers=("NCH", "OIH", "NCH"),
            precision=lax.Precision.HIGHEST,
        ) + p["b"][None, :, None]
        if p["activate"]:
            h = jnp.where(h > 0, h, _ALPHA * h)
    return h


if __name__ == "__main__":
    key = jax.random.PRNGKey(0)
    k_x, k_p, k_pv, k_eps = jax.random.split(key, 4)

    # Small config: channels=[4, 8, 16], output_size=8, input (N=2, C=4, T=16)
    channels = [4, 8, 16]
    output_size = 8
    x = jax.random.normal(k_x, (2, 4, 16), jnp.float32)

    # --- non-VAE encoder path ---
    params = init_motion_encoder_params(k_p, channels, output_size, vae_encoder=False)
    out, mean, logvar = motion_encoder_forward(x, params, vae_encoder=False)
    out = jax.block_until_ready(out)
    assert out.shape == (2, output_size, 4) and mean is None and logvar is None

    # bf16 MXU operands (f32 accumulate) -> slightly looser tolerance vs f32 ref
    ref = _reference_forward(x, params)
    assert jnp.allclose(out, ref, atol=5e-2, rtol=5e-2), "mismatch vs lax reference"

    # --- VAE encoder path (reparametrize kept in plain JAX; pure RNG glue) ---
    params_v = init_motion_encoder_params(k_pv, channels, output_size, vae_encoder=True)
    z, mean_v, logvar_v = motion_encoder_forward(x, params_v, vae_encoder=True, rng=k_eps)
    jax.block_until_ready(z)
    assert z.shape == (2, output_size, 4)
    assert mean_v.shape == (2, output_size, 4) and logvar_v.shape == (2, output_size, 4)

    ref_v = _reference_forward(x, params_v)
    assert jnp.allclose(mean_v, ref_v[:, :output_size], atol=5e-2, rtol=5e-2)
    assert jnp.allclose(logvar_v, ref_v[:, output_size:], atol=5e-2, rtol=5e-2)

    print("KERNEL_OK")
</pallas_src>

<mosaic_0001>
module attributes {stable_mosaic.version = 11 : i64} {
  func.func @kernel(%arg0: i32, %arg1: memref<1x16x128xf32, #tpu.memory_space<vmem>>, %arg2: memref<3x128x128xbf16, #tpu.memory_space<vmem>>, %arg3: memref<1x128xf32, #tpu.memory_space<vmem>>, %arg4: memref<3x128x128xbf16, #tpu.memory_space<vmem>>, %arg5: memref<1x128xf32, #tpu.memory_space<vmem>>, %arg6: memref<1x128x128xbf16, #tpu.memory_space<vmem>>, %arg7: memref<1x128xf32, #tpu.memory_space<vmem>>, %arg8: memref<1x4x128xf32, #tpu.memory_space<vmem>>, %arg9: memref<18x128xf32, #tpu.memory_space<vmem>>, %arg10: memref<10x128xf32, #tpu.memory_space<vmem>>) attributes {dimension_semantics = [#tpu.dimension_semantics<parallel>], iteration_bounds = array<i64: 2>, scalar_prefetch = 0 : i64, scratch_operands = 2 : i64, tpu.core_type = #tpu.core_type<tc>, window_params = [{transform_indices = @transform_0, window_bounds = array<i64: 1, 16, 128>}, {pipeline_mode = #tpu.pipeline_mode<synchronous>, transform_indices = @transform_1, window_bounds = array<i64: 3, 128, 128>}, {pipeline_mode = #tpu.pipeline_mode<synchronous>, transform_indices = @transform_2, window_bounds = array<i64: 1, 128>}, {pipeline_mode = #tpu.pipeline_mode<synchronous>, transform_indices = @transform_3, window_bounds = array<i64: 3, 128, 128>}, {pipeline_mode = #tpu.pipeline_mode<synchronous>, transform_indices = @transform_4, window_bounds = array<i64: 1, 128>}, {pipeline_mode = #tpu.pipeline_mode<synchronous>, transform_indices = @transform_5, window_bounds = array<i64: 1, 128, 128>}, {pipeline_mode = #tpu.pipeline_mode<synchronous>, transform_indices = @transform_6, window_bounds = array<i64: 1, 128>}, {transform_indices = @transform_7, window_bounds = array<i64: 1, 4, 128>}]} {
    %c0 = arith.constant 0 : index
    %c0_0 = arith.constant 0 : index
    %c0_1 = arith.constant 0 : index
    %0 = vector.load %arg1[%c0, %c0_0, %c0_1] : memref<1x16x128xf32, #tpu.memory_space<vmem>>, vector<1x16x128xf32>
    %1 = vector.shape_cast %0 : vector<1x16x128xf32> to vector<16x128xf32>
    %cst = arith.constant 0.000000e+00 : f32
    %2 = vector.broadcast %cst : f32 to vector<1x128xf32>
    %c0_2 = arith.constant 0 : index
    %c0_3 = arith.constant 0 : index
    %3 = vector.load %arg9[%c0_2, %c0_3] : memref<18x128xf32, #tpu.memory_space<vmem>>, vector<1x128xf32>
    tpu.vector_store %arg9[%c0_2, %c0_3], %2 {strides = array<i32>} : memref<18x128xf32, #tpu.memory_space<vmem>>, vector<1x128xf32>,
    %cst_4 = arith.constant 0.000000e+00 : f32
    %4 = vector.broadcast %cst_4 : f32 to vector<1x128xf32>
    %c17 = arith.constant 17 : index
    %c0_5 = arith.constant 0 : index
    %5 = vector.load %arg9[%c17, %c0_5] : memref<18x128xf32, #tpu.memory_space<vmem>>, vector<1x128xf32>
    tpu.vector_store %arg9[%c17, %c0_5], %4 {strides = array<i32>} : memref<18x128xf32, #tpu.memory_space<vmem>>, vector<1x128xf32>,
    %c1 = arith.constant 1 : index
    %c0_6 = arith.constant 0 : index
    %6 = vector.load %arg9[%c1, %c0_6] : memref<18x128xf32, #tpu.memory_space<vmem>>, vector<16x128xf32>
    tpu.vector_store %arg9[%c1, %c0_6], %1 {strides = array<i32>} : memref<18x128xf32, #tpu.memory_space<vmem>>, vector<16x128xf32>,
    %c0_7 = arith.constant 0 : index
    %c0_8 = arith.constant 0 : index
    %7 = tpu.strided_load %arg9[%c0_7, %c0_8] {strides = array<i32: 2, 1>} : memref<18x128xf32, #tpu.memory_space<vmem>>, vector<8x128xf32>
    %8 = arith.truncf %7 : vector<8x128xf32> to vector<8x128xbf16>
    %c0_9 = arith.constant 0 : index
    %c0_10 = arith.constant 0 : index
    %c0_11 = arith.constant 0 : index
    %9 = vector.load %arg2[%c0_9, %c0_10, %c0_11] : memref<3x128x128xbf16, #tpu.memory_space<vmem>>, vector<1x128x128xbf16>
    %10 = vector.shape_cast %9 : vector<1x128x128xbf16> to vector<128x128xbf16>
    %cst_12 = arith.constant dense<0.000000e+00> : vector<8x128xf32>
    %11 = tpu.matmul %8, %10, %cst_12 {dimension_numbers = #tpu.dot_dimension_numbers<[1], [0], [0], [1], [0, 0, 1, 1], [], []>} : vector<8x128xbf16>, vector<128x128xbf16>, vector<8x128xf32> -> vector<8x128xf32>
    %c1_13 = arith.constant 1 : index
    %c0_14 = arith.constant 0 : index
    %12 = tpu.strided_load %arg9[%c1_13, %c0_14] {strides = array<i32: 2, 1>} : memref<18x128xf32, #tpu.memory_space<vmem>>, vector<8x128xf32>
    %13 = arith.truncf %12 : vector<8x128xf32> to vector<8x128xbf16>
    %c1_15 = arith.constant 1 : index
    %c0_16 = arith.constant 0 : index
    %c0_17 = arith.constant 0 : index
    %14 = vector.load %arg2[%c1_15, %c0_16, %c0_17] : memref<3x128x128xbf16, #tpu.memory_space<vmem>>, vector<1x128x128xbf16>
    %15 = vector.shape_cast %14 : vector<1x128x128xbf16> to vector<128x128xbf16>
    %cst_18 = arith.constant dense<0.000000e+00> : vector<8x128xf32>
    %16 = tpu.matmul %13, %15, %cst_18 {dimension_numbers = #tpu.dot_dimension_numbers<[1], [0], [0], [1], [0, 0, 1, 1], [], []>} : vector<8x128xbf16>, vector<128x128xbf16>, vector<8x128xf32> -> vector<8x128xf32>
    %17 = arith.addf %11, %16 : vector<8x128xf32>
    %c2 = arith.constant 2 : index
    %c0_19 = arith.constant 0 : index
    %18 = tpu.strided_load %arg9[%c2, %c0_19] {strides = array<i32: 2, 1>} : memref<18x128xf32, #tpu.memory_space<vmem>>, vector<8x128xf32>
    %19 = arith.truncf %18 : vector<8x128xf32> to vector<8x128xbf16>
    %c2_20 = arith.constant 2 : index
    %c0_21 = arith.constant 0 : index
    %c0_22 = arith.constant 0 : index
    %20 = vector.load %arg2[%c2_20, %c0_21, %c0_22] : memref<3x128x128xbf16, #tpu.memory_space<vmem>>, vector<1x128x128xbf16>
    %21 = vector.shape_cast %20 : vector<1x128x128xbf16> to vector<128x128xbf16>
    %cst_23 = arith.constant dense<0.000000e+00> : vector<8x128xf32>
    %22 = tpu.matmul %19, %21, %cst_23 {dimension_numbers = #tpu.dot_dimension_numbers<[1], [0], [0], [1], [0, 0, 1, 1], [], []>} : vector<8x128xbf16>, vector<128x128xbf16>, vector<8x128xf32> -> vector<8x128xf32>
    %23 = arith.addf %17, %22 : vector<8x128xf32>
    %c0_24 = arith.constant 0 : index
    %c0_25 = arith.constant 0 : index
    %24 = vector.load %arg3[%c0_24, %c0_25] : memref<1x128xf32, #tpu.memory_space<vmem>>, vector<1x128xf32>
    %25 = vector.broadcast %24 : vector<1x128xf32> to vector<8x128xf32>
    %26 = arith.addf %23, %25 : vector<8x128xf32>
    %cst_26 = arith.constant 0.000000e+00 : f32
    %27 = vector.broadcast %cst_26 : f32 to vector<8x128xf32>
    %28 = arith.cmpf ogt, %26, %27 : vector<8x128xf32>
    %cst_27 = arith.constant 2.000000e-01 : f32
    %29 = vector.broadcast %cst_27 : f32 to vector<8x128xf32>
    %30 = arith.mulf %29, %26 : vector<8x128xf32>
    %31 = arith.select %28, %26, %30 : vector<8x128xi1>, vector<8x128xf32>
    %cst_28 = arith.constant 0.000000e+00 : f32
    %32 = vector.broadcast %cst_28 : f32 to vector<1x128xf32>
    %c0_29 = arith.constant 0 : index
    %c0_30 = arith.constant 0 : index
    %33 = vector.load %arg10[%c0_29, %c0_30] : memref<10x128xf32, #tpu.memory_space<vmem>>, vector<1x128xf32>
    tpu.vector_store %arg10[%c0_29, %c0_30], %32 {strides = array<i32>} : memref<10x128xf32, #tpu.memory_space<vmem>>, vector<1x128xf32>,
    %cst_31 = arith.constant 0.000000e+00 : f32
    %34 = vector.broadcast %cst_31 : f32 to vector<1x128xf32>
    %c9 = arith.constant 9 : index
    %c0_32 = arith.constant 0 : index
    %35 = vector.load %arg10[%c9, %c0_32] : memref<10x128xf32, #tpu.memory_space<vmem>>, vector<1x128xf32>
    tpu.vector_store %arg10[%c9, %c0_32], %34 {strides = array<i32>} : memref<10x128xf32, #tpu.memory_space<vmem>>, vector<1x128xf32>,
    %c1_33 = arith.constant 1 : index
    %c0_34 = arith.constant 0 : index
    %36 = vector.load %arg10[%c1_33, %c0_34] : memref<10x128xf32, #tpu.memory_space<vmem>>, vector<8x128xf32>
    tpu.vector_store %arg10[%c1_33, %c0_34], %31 {strides = array<i32>} : memref<10x128xf32, #tpu.memory_space<vmem>>, vector<8x128xf32>,
    %c0_35 = arith.constant 0 : index
    %c0_36 = arith.constant 0 : index
    %37 = tpu.strided_load %arg10[%c0_35, %c0_36] {strides = array<i32: 2, 1>} : memref<10x128xf32, #tpu.memory_space<vmem>>, vector<4x128xf32>
    %38 = arith.truncf %37 : vector<4x128xf32> to vector<4x128xbf16>
    %c0_37 = arith.constant 0 : index
    %c0_38 = arith.constant 0 : index
    %c0_39 = arith.constant 0 : index
    %39 = vector.load %arg4[%c0_37, %c0_38, %c0_39] : memref<3x128x128xbf16, #tpu.memory_space<vmem>>, vector<1x128x128xbf16>
    %40 = vector.shape_cast %39 : vector<1x128x128xbf16> to vector<128x128xbf16>
    %cst_40 = arith.constant dense<0.000000e+00> : vector<4x128xf32>
    %41 = tpu.matmul %38, %40, %cst_40 {dimension_numbers = #tpu.dot_dimension_numbers<[1], [0], [0], [1], [0, 0, 1, 1], [], []>} : vector<4x128xbf16>, vector<128x128xbf16>, vector<4x128xf32> -> vector<4x128xf32>
    %c1_41 = arith.constant 1 : index
    %c0_42 = arith.constant 0 : index
    %42 = tpu.strided_load %arg10[%c1_41, %c0_42] {strides = array<i32: 2, 1>} : memref<10x128xf32, #tpu.memory_space<vmem>>, vector<4x128xf32>
    %43 = arith.truncf %42 : vector<4x128xf32> to vector<4x128xbf16>
    %c1_43 = arith.constant 1 : index
    %c0_44 = arith.constant 0 : index
    %c0_45 = arith.constant 0 : index
    %44 = vector.load %arg4[%c1_43, %c0_44, %c0_45] : memref<3x128x128xbf16, #tpu.memory_space<vmem>>, vector<1x128x128xbf16>
    %45 = vector.shape_cast %44 : vector<1x128x128xbf16> to vector<128x128xbf16>
    %cst_46 = arith.constant dense<0.000000e+00> : vector<4x128xf32>
    %46 = tpu.matmul %43, %45, %cst_46 {dimension_numbers = #tpu.dot_dimension_numbers<[1], [0], [0], [1], [0, 0, 1, 1], [], []>} : vector<4x128xbf16>, vector<128x128xbf16>, vector<4x128xf32> -> vector<4x128xf32>
    %47 = arith.addf %41, %46 : vector<4x128xf32>
    %c2_47 = arith.constant 2 : index
    %c0_48 = arith.constant 0 : index
    %48 = tpu.strided_load %arg10[%c2_47, %c0_48] {strides = array<i32: 2, 1>} : memref<10x128xf32, #tpu.memory_space<vmem>>, vector<4x128xf32>
    %49 = arith.truncf %48 : vector<4x128xf32> to vector<4x128xbf16>
    %c2_49 = arith.constant 2 : index
    %c0_50 = arith.constant 0 : index
    %c0_51 = arith.constant 0 : index
    %50 = vector.load %arg4[%c2_49, %c0_50, %c0_51] : memref<3x128x128xbf16, #tpu.memory_space<vmem>>, vector<1x128x128xbf16>
    %51 = vector.shape_cast %50 : vector<1x128x128xbf16> to vector<128x128xbf16>
    %cst_52 = arith.constant dense<0.000000e+00> : vector<4x128xf32>
    %52 = tpu.matmul %49, %51, %cst_52 {dimension_numbers = #tpu.dot_dimension_numbers<[1], [0], [0], [1], [0, 0, 1, 1], [], []>} : vector<4x128xbf16>, vector<128x128xbf16>, vector<4x128xf32> -> vector<4x128xf32>
    %53 = arith.addf %47, %52 : vector<4x128xf32>
    %c0_53 = arith.constant 0 : index
    %c0_54 = arith.constant 0 : index
    %54 = vector.load %arg5[%c0_53, %c0_54] : memref<1x128xf32, #tpu.memory_space<vmem>>, vector<1x128xf32>
    %55 = vector.broadcast %54 : vector<1x128xf32> to vector<4x128xf32>
    %56 = arith.addf %53, %55 : vector<4x128xf32>
    %cst_55 = arith.constant 0.000000e+00 : f32
    %57 = vector.broadcast %cst_55 : f32 to vector<4x128xf32>
    %58 = arith.cmpf ogt, %56, %57 : vector<4x128xf32>
    %cst_56 = arith.constant 2.000000e-01 : f32
    %59 = vector.broadcast %cst_56 : f32 to vector<4x128xf32>
    %60 = arith.mulf %59, %56 : vector<4x128xf32>
    %61 = arith.select %58, %56, %60 : vector<4x128xi1>, vector<4x128xf32>
    %62 = arith.truncf %61 : vector<4x128xf32> to vector<4x128xbf16>
    %c0_57 = arith.constant 0 : index
    %c0_58 = arith.constant 0 : index
    %c0_59 = arith.constant 0 : index
    %63 = vector.load %arg6[%c0_57, %c0_58, %c0_59] : memref<1x128x128xbf16, #tpu.memory_space<vmem>>, vector<1x128x128xbf16>
    %64 = vector.shape_cast %63 : vector<1x128x128xbf16> to vector<128x128xbf16>
    %cst_60 = arith.constant dense<0.000000e+00> : vector<4x128xf32>
    %65 = tpu.matmul %62, %64, %cst_60 {dimension_numbers = #tpu.dot_dimension_numbers<[1], [0], [0], [1], [0, 0, 1, 1], [], []>} : vector<4x128xbf16>, vector<128x128xbf16>, vector<4x128xf32> -> vector<4x128xf32>
    %c0_61 = arith.constant 0 : index
    %c0_62 = arith.constant 0 : index
    %66 = vector.load %arg7[%c0_61, %c0_62] : memref<1x128xf32, #tpu.memory_space<vmem>>, vector<1x128xf32>
    %67 = vector.broadcast %66 : vector<1x128xf32> to vector<4x128xf32>
    %68 = arith.addf %65, %67 : vector<4x128xf32>
    %c0_63 = arith.constant 0 : index
    %c0_64 = arith.constant 0 : index
    %c0_65 = arith.constant 0 : index
    %69 = vector.load %arg8[%c0_63, %c0_64, %c0_65] : memref<1x4x128xf32, #tpu.memory_space<vmem>>, vector<1x4x128xf32>
    %70 = vector.shape_cast %69 : vector<1x4x128xf32> to vector<4x128xf32>
    %71 = vector.shape_cast %68 : vector<4x128xf32> to vector<1x4x128xf32>
    tpu.vector_store %arg8[%c0_63, %c0_64, %c0_65], %71 {strides = array<i32>} : memref<1x4x128xf32, #tpu.memory_space<vmem>>, vector<1x4x128xf32>,
    return
  }
  func.func @transform_0(%arg0: i32) -> (i32, i32, i32) {
    %c0_i32 = arith.constant 0 : i32
    %c0_i32_0 = arith.constant 0 : i32
    %c0_i32_1 = arith.constant 0 : i32
    return %arg0, %c0_i32, %c0_i32_0 : i32, i32, i32
  }
  func.func @transform_1(%arg0: i32) -> (i32, i32, i32) {
    %c0_i32 = arith.constant 0 : i32
    %c0_i32_0 = arith.constant 0 : i32
    %c0_i32_1 = arith.constant 0 : i32
    %c0_i32_2 = arith.constant 0 : i32
    return %c0_i32, %c0_i32_0, %c0_i32_1 : i32, i32, i32
  }
  func.func @transform_2(%arg0: i32) -> (i32, i32) {
    %c0_i32 = arith.constant 0 : i32
    %c0_i32_0 = arith.constant 0 : i32
    %c0_i32_1 = arith.constant 0 : i32
    return %c0_i32, %c0_i32_0 : i32, i32
  }
  func.func @transform_3(%arg0: i32) -> (i32, i32, i32) {
    %c0_i32 = arith.constant 0 : i32
    %c0_i32_0 = arith.constant 0 : i32
    %c0_i32_1 = arith.constant 0 : i32
    %c0_i32_2 = arith.constant 0 : i32
    return %c0_i32, %c0_i32_0, %c0_i32_1 : i32, i32, i32
  }
  func.func @transform_4(%arg0: i32) -> (i32, i32) {
    %c0_i32 = arith.constant 0 : i32
    %c0_i32_0 = arith.constant 0 : i32
    %c0_i32_1 = arith.constant 0 : i32
    return %c0_i32, %c0_i32_0 : i32, i32
  }
  func.func @transform_5(%arg0: i32) -> (i32, i32, i32) {
    %c0_i32 = arith.constant 0 : i32
    %c0_i32_0 = arith.constant 0 : i32
    %c0_i32_1 = arith.constant 0 : i32
    %c0_i32_2 = arith.constant 0 : i32
    return %c0_i32, %c0_i32_0, %c0_i32_1 : i32, i32, i32
  }
  func.func @transform_6(%arg0: i32) -> (i32, i32) {
    %c0_i32 = arith.constant 0 : i32
    %c0_i32_0 = arith.constant 0 : i32
    %c0_i32_1 = arith.constant 0 : i32
    return %c0_i32, %c0_i32_0 : i32, i32
  }
  func.func @transform_7(%arg0: i32) -> (i32, i32, i32) {
    %c0_i32 = arith.constant 0 : i32
    %c0_i32_0 = arith.constant 0 : i32
    %c0_i32_1 = arith.constant 0 : i32
    return %arg0, %c0_i32, %c0_i32_0 : i32, i32, i32
  }
}

</mosaic_0001>

<bundles_post_ra>
// kernel: tpu_custom_call.1
= control target key start
LH: loop header
LB: loop body
LE: loop exit
PB: predicated region body
PF: predicated region fallthrough
CT: control target
= control target key end

     0   :  { %12 = vsyncpa [#allocation5], 0  ;;  %s2259_s0 = inlined_call_operand.hbm [shape: f32[2,16,128], index: 0, kind: input, shape index: {}]   ;;  %s2260_s1 = inlined_call_operand.hbm [shape: bf16[3,128,128], index: 1, kind: input, shape index: {}]   ;;  %s2261_s2 = inlined_call_operand.vmem [shape: f32[1,128], index: 2, kind: input, shape index: {}]   ;;  %s2262_s3 = inlined_call_operand.hbm [shape: bf16[3,128,128], index: 3, kind: input, shape index: {}]   ;;  %s2263_s4 = inlined_call_operand.vmem [shape: f32[1,128], index: 4, kind: input, shape index: {}]   ;;  %s2264_s5 = inlined_call_operand.hbm [shape: bf16[1,128,128], index: 5, kind: input, shape index: {}]   ;;  %s2265_s6 = inlined_call_operand.vmem [shape: f32[1,128], index: 6, kind: input, shape index: {}]   ;;  %s2266_s7 = inlined_call_operand.hbm [shape: f32[2,4,128], index: 7, kind: output, shape index: {}]  }
   0x1   :  { %14 = vsyncpa [#allocation5 + $0x1], 0 }
   0x2   :  { %15 = vsyncpa [#allocation8], 0 }
   0x3   :  { %16 = vsyncpa [#allocation11], 0 }
   0x4   :  { %17 = vsyncpa [#allocation6], 0 }
   0x5   :  { %19 = vsyncpa [#allocation6 + $0x1], 0  ;;  %s1907_s24 = smov 0   ;;  %s1909_s25 = smov 0  }
   0x6   :  { %s1911_s26 = smov 0   ;;  %s1913_s27 = smov 0  }
   0x7 LB: > { %s1928_s28 = sadd.s32 4294967295, %s1854_s27   ;;  %s1245_s29 = sadd.s32 4294967294, %s1854_s27   ;;  %s1854_s27 = sphi %s1913_s27, %s2292_s27   ;;  %s1850_s26 = sphi %s1911_s26, %s2291_s26   ;;  %s1846_s25 = sphi %s1909_s25, %s2290_s25   ;;  %s1842_s24 = sphi %s1907_s24, %s2289_s24  }
   0x8   : > { %p45_p0 = scmp.ne.s32.totalorder %s1846_s25, %s1842_s24  ;;  %p2267_p1 = scmp.eq.s32.totalorder %s1928_s28, 0 }
   0x9   : > { %p201_p3 = scmp.eq.s32.totalorder %s1245_s29, 1  ;;  %p1246_p5 = scmp.ge.s32.totalorder %s1854_s27, 1 }
   0xa   : > { %p1937_p4 = por %p2267_p1, %p45_p0  ;;  %p208_p7 = scmp.lt.s32.totalorder %s1854_s27, 3 }
   0xb   : > { %p1942_p6 = por %p201_p3, %p45_p0  ;;  %s1856_s10 = smov [#allocation7]  }
   0xc   : > { %s2271_s30 = scalar_select %p1937_p4, 1, 0 }
   0xd   : > { %s2272_s8 = scalar_select %p1942_p6, 1, 0 }
   0xe   : > { %p1947_p8 = pnand %p1246_p5, %p208_p7  ;;  %s220_s11 = sshll.u32 %s1856_s10, 4  ;;  %s1951_s11 = int_to_ptr.vmem [resolvable:$true] %s220_s11 }
   0xf   : > { %2273 = sst [smem:[#allocation17_spill]] %s2272_s8  ;;  %s1857_s13 = smov [#allocation9]  }
  0x10   : > { %s2274_s9 = scalar_select %p1947_p8, 1, 0 }
  0x11   : > { %p1543_p9 = pneg %p1947_p8  ;;  %s236_s14 = sshll.u32 %s1857_s13, 4  ;;  %s1962_s14 = int_to_ptr.vmem [resolvable:$true] %s236_s14 }
  0x12   : > { %s1858_s15 = smov [#allocation10]   ;;  %s1666_s19 = scalar_lea.hbm %s2260_s1, 3072 }
  0x13   : > { %p1958_p11 = pnand %p1543_p9, %p2267_p1  ;;  %s1964_s16 = sshll.u32 %s1858_s15, 4  ;;  %s253_s16 = int_to_ptr.vmem [resolvable:$true] %s1964_s16 }
  0x14   : > { %p1667_p12 = scmp.ne.s32.totalorder %s2260_s1, %s1666_s19  ;;  %p1673_p5 = scmp.lt.u32.totalorder %s1666_s19, %s2260_s1 }
  0x15   : > { %p1974_p13 = pneg %p1958_p11 }
  0x17   : > { %p1669_p0 = pnand %p1974_p13, %p1667_p12 }
  0x19   : > { %p1670_p3 = pneg %p1669_p0 }
  0x1b   : > { %p1675_p7 = pnand %p1673_p5, %p1670_p3 }
  0x1d   : > { %1678 = shalt.err (!%p1675_p7)
}
  0x1e   : > { %s1679_s10 = scalar_lea.vmem %s1951_s11, 3072  ;;  %p1687_p2 = scmp.lt.s32.totalorder %s1951_s11, %s1951_s11 }
  0x1f   : > { %p1680_p9 = scmp.ne.s32.totalorder %s1951_s11, %s1679_s10  ;;  %p1688_p6 = scmp.lt.s32.totalorder %s1679_s10, %s1679_s10 }
  0x21   : > { %p1682_p10 = pnand %p1680_p9, %p1974_p13  ;;  %p1689_p12 = por %p1688_p6, %p1687_p2 }
  0x23   : > { %p1683_p1 = pneg %p1682_p10 }
  0x25   : > { %p1690_p0 = pnand %p1689_p12, %p1683_p1 }
  0x27   : > { %1693 = shalt.err (!%p1690_p0)
}
  0x28   : > { %s1859_s13 = smov 64   ;;  %s1860_s15 = smov 4  }
  0x29   : > { %1546 = dma.hbm_to_vmem [thread:$0]  (!%p1958_p11), %s2260_s1, 3072, %s1951_s11, [#allocation8], %s1859_s13, %s1859_s13, %s1860_s15  }
  0x2a   : > { %s1694_s21 = scalar_lea.hbm %s2262_s3, 3072 }
  0x2b   : > { %p1695_p1 = scmp.ne.s32.totalorder %s2262_s3, %s1694_s21  ;;  %p1701_p10 = scmp.lt.u32.totalorder %s1694_s21, %s2262_s3 }
  0x2d   : > { %p1697_p2 = pnand %p1695_p1, %p1974_p13 }
  0x2f   : > { %p1698_p6 = pneg %p1697_p2 }
  0x31   : > { %p1703_p3 = pnand %p1701_p10, %p1698_p6 }
  0x33   : > { %1706 = shalt.err (!%p1703_p3)
}
  0x34   : > { %s1707_s11 = scalar_lea.vmem %s1962_s14, 3072  ;;  %p1715_p12 = scmp.lt.s32.totalorder %s1962_s14, %s1962_s14 }
  0x35   : > { %p1708_p5 = scmp.ne.s32.totalorder %s1962_s14, %s1707_s11  ;;  %p1716_p0 = scmp.lt.s32.totalorder %s1707_s11, %s1707_s11 }
  0x37   : > { %p1710_p7 = pnand %p1708_p5, %p1974_p13  ;;  %p1717_p1 = por %p1716_p0, %p1715_p12 }
  0x39   : > { %p1711_p9 = pneg %p1710_p7 }
  0x3b   : > { %p1718_p2 = pnand %p1717_p1, %p1711_p9 }
  0x3d   : > { %1721 = shalt.err (!%p1718_p2)
}
  0x3e   : > { %1549 = dma.hbm_to_vmem [thread:$0]  (!%p1958_p11), %s2262_s3, 3072, %s1962_s14, [#allocation8], %s1859_s13, %s1859_s13, %s1860_s15  }
  0x3f   : > { %s1722_s20 = scalar_lea.hbm %s2264_s5, 1024 }
  0x40   : > { %p1723_p6 = scmp.ne.s32.totalorder %s2264_s5, %s1722_s20  ;;  %p1729_p5 = scmp.lt.u32.totalorder %s1722_s20, %s2264_s5 }
  0x42   : > { %p1725_p10 = pnand %p1723_p6, %p1974_p13 }
  0x44   : > { %p1726_p3 = pneg %p1725_p10 }
  0x46   : > { %p1731_p7 = pnand %p1729_p5, %p1726_p3 }
  0x48   : > { %1734 = shalt.err (!%p1731_p7)
}
  0x49   : > { %s1735_s11 = scalar_lea.vmem %s253_s16, 1024  ;;  %p1743_p1 = scmp.lt.s32.totalorder %s253_s16, %s253_s16 }
  0x4a   : > { %p1736_p9 = scmp.ne.s32.totalorder %s253_s16, %s1735_s11  ;;  %p1744_p2 = scmp.lt.s32.totalorder %s1735_s11, %s1735_s11 }
  0x4c   : > { %p1738_p12 = pnand %p1736_p9, %p1974_p13  ;;  %p1745_p4 = por %p1744_p2, %p1743_p1 }
  0x4e   : > { %p1739_p0 = pneg %p1738_p12 }
  0x50   : > { %p1746_p8 = pnand %p1745_p4, %p1739_p0 }
  0x52   : > { %1749 = shalt.err (!%p1746_p8)
}
  0x53   : > { %1552 = dma.hbm_to_vmem [thread:$0]  (!%p1958_p11), %s2264_s5, 1024, %s253_s16, [#allocation11], %s1859_s13, %s1859_s13, %s1860_s15  }
  0x54   : > { %s2047_s22 = sadd.s32 1, %s1854_s27   ;;  %s32_s17 = sadd.s32 1, %s1850_s26 }
  0x55   : > { %s29_s12 = ssub.s32 %s1854_s27, %s2047_s22  ;;  %p39_p8 = scmp.ne.s32.totalorder %s1850_s26, %s1846_s25 }
  0x56   : > { %p30_p4 = scmp.eq.s32.totalorder %s29_s12, 0  ;;  %p40_p13 = scmp.eq.s32.totalorder %s1854_s27, 0 }
  0x57   : > { %p1564_p6 = scmp.lt.s32.totalorder %s1854_s27, 2  ;;  %p2277_p3 = scmp.eq.s32.totalorder %s1928_s28, 1 }
  0x58   : > { %s2057_s18 = scalar_select %p30_p4, %s1850_s26, %s32_s17  }
  0x59   : > { %p41_p10 = por %p40_p13, %p39_p8  ;;  %p2061_p5 = por %p2277_p3, %p39_p8 }
  0x5a   : > { %s269_s20 = sand.u32 1, %s1850_s26   ;;  %s1323_s21 = sshll.u32 %s1854_s27, 8 }
  0x5b   : > { %s1251_s16 = sshll.u32 %s269_s20, 4  ;;  %s2070_s23 = scalar_lea.hbm %s2259_s0, %s1323_s21 }
  0x5c   : > { %s273_s29 = scalar_lea.vmem [#allocation4], %s1251_s16  ;;  %p2072_p11 = pnand %p1564_p6, %p41_p10 }
  0x5d   : > { %s280_s10 = sshll.u32 %s273_s29, 4  ;;  %s2078_s14 = scalar_lea.sflag [#allocation5], %s269_s20  ;;  %s2076_s10 = int_to_ptr.vmem [resolvable:$true] %s280_s10 }
  0x5e   : > { %s1750_s8 = scalar_lea.hbm %s2070_s23, 256  ;;  %p1752_p9 = pneg %p2072_p11 }
  0x5f   : > { %p1751_p7 = scmp.ne.s32.totalorder %s2070_s23, %s1750_s8  ;;  %s1755_s21 = scalar_lea.hbm %s2259_s0, 512 }
  0x60   : > { %p1756_p1 = scmp.lt.u32.totalorder %s2070_s23, %s2259_s0  ;;  %p1757_p2 = scmp.lt.u32.totalorder %s1755_s21, %s1750_s8 }
  0x61   : > { %p1753_p12 = pnand %p1752_p9, %p1751_p7  ;;  %p1759_p8 = scmp.lt.u32.totalorder %s1750_s8, %s2070_s23 }
  0x62   : > { %p1758_p4 = por %p1757_p2, %p1756_p1 }
  0x63   : > { %p1754_p0 = pneg %p1753_p12 }
  0x64   : > { %p1760_p13 = por %p1759_p8, %p1758_p4 }
  0x66   : > { %p1761_p6 = pnand %p1760_p13, %p1754_p0 }
  0x68   : > { %1764 = shalt.err (!%p1761_p6)
}
  0x69   : > { %s1765_s20 = scalar_lea.vmem %s2076_s10, 256  ;;  %s1861_s15 = smov [#allocation4]  }
  0x6a   : > { %p1766_p10 = scmp.ne.s32.totalorder %s2076_s10, %s1765_s20  ;;  %s1770_s29 = sshll.u32 %s1861_s15, 4  ;;  %s1771_s29 = int_to_ptr.vmem [resolvable:$false] %s1770_s29 }
  0x6b   : > { %s1772_s12 = scalar_lea.vmem %s1771_s29, 512  ;;  %p1773_p12 = scmp.lt.s32.totalorder %s2076_s10, %s1771_s29 }
  0x6c   : > { %p1768_p3 = pnand %p1766_p10, %p1752_p9  ;;  %p1774_p1 = scmp.lt.s32.totalorder %s1772_s12, %s1765_s20 }
  0x6e   : > { %p1769_p7 = pneg %p1768_p3  ;;  %p1775_p2 = por %p1774_p1, %p1773_p12 }
  0x70   : > { %p1776_p4 = pnand %p1775_p2, %p1769_p7 }
  0x72   : > { %1779 = shalt.err (!%p1776_p4)
}
  0x73   : > { %s1862_s8 = smov 128   ;;  %s1863_s17 = smov 8  }
  0x74   : > { %1556 = dma.hbm_to_vmem [thread:$0]  (!%p2072_p11), %s2070_s23, 256, %s2076_s10, %s2078_s14, %s1862_s8, %s1862_s8, %s1863_s17  }
  0x75   : > { %p2280_p9 = scmp.ne.s32.totalorder %s2274_s9, 0 }
  0x76   : > { %s2109_s21 = sand.u32 (!%p2280_p9), 1, %s1846_s25   ;;  %p2281_p0 = scmp.ne.s32.totalorder (!%p2280_p9), %s2271_s30, 0 }
  0x77   : > { %292 = sbr.rel (%p2280_p9) target bundleno = 910 (0x38e), region = 48  ;;  %s1255_s16 = sshll.u32 (!%p2280_p9), %s2109_s21, 4 }
  0x78   : > { %s295_s13 = scalar_lea.sflag (!%p2280_p9), [#allocation5], %s2109_s21  ;;  %s2113_s20 = scalar_lea.vmem (!%p2280_p9), [#allocation4], %s1255_s16 }
  0x7e   : > { %1825 = dma.done.wait (%p2281_p0), %s295_s13, 256  }
  0x7f   : > { %1827 = vsyncadd (%p2281_p0), %s295_s13, 4294967040  ;;  %p2282_p11 = scmp.eq.s32.totalorder %s1928_s28, 0 }
  0x81   : > { %1829 = dma.done.wait (%p2282_p11), [#allocation8], 6144   ;;  %p2283_p8 = pmov %p2282_p11 }
  0x83   : > { %1831 = vsyncadd (%p2283_p8), [#allocation8], 4294961152  ;;  %p2284_p13 = pmov %p2283_p8 }
  0x84   : > { %p2285_p6 = pmov %p2283_p8 }
  0x85   : > { %1833 = dma.done.wait (%p2284_p13), [#allocation11], 1024  }
  0x86   : > { %1835 = vsyncadd (%p2285_p6), [#allocation11], 4294966272  ;;  %v1864_v0 = vmov 0.0   ;;  %vm1865_vm0 = vmmov 0   ;;  %v1610_v1 = vld [vmem:[#allocation7 + $0x40] sm:$0xff]   ;;  %v1612_v3 = vld [vmem:[#allocation7 + $0x48] sm:$0xff]  }
  0x87   : > { %344 = vst [vmem:[#allocation2] sm:$0x1] %v1864_v0  ;;  %682 = vst [vmem:[#allocation3] sm:$0x1] %v1864_v0  ;;  %1387 = vmatprep.subr.bf16.mxu0 %v1864_v0  ;;  %1407 = vmatprep.subr.bf16.mxu1 %v1864_v0  ;;  %v1611_v2 = vld [vmem:[#allocation7] sm:$0xff]   ;;  %v1613_v4 = vld [vmem:[#allocation7 + $0x8] sm:$0xff]  }
  0x88   : > { %1403 = vmatprep.mubr.msk.bf16.mxu0 %vm1865_vm0, %v1864_v0  ;;  %1423 = vmatprep.mubr.msk.bf16.mxu1 %vm1865_vm0, %v1864_v0  ;;  %v1614_v5 = vld [vmem:[#allocation7 + $0x50] sm:$0xff]   ;;  %v1616_v7 = vld [vmem:[#allocation7 + $0x58] sm:$0xff]   ;;  %v1618_v9 = vld [vmem:[#allocation7 + $0x60] sm:$0xff]   ;;  %s1259_s11 = sshll.u32 %s2109_s21, 2  ;;  %s1320_s29 = sshll.u32 %s1928_s28, 6 }
  0x89   : > { %1388 = vmatpush3.bf16.msra.mxu0 %v1610_v1  ;;  %1408 = vmatpush3.bf16.msra.mxu1 %v1611_v2  ;;  %v1615_v6 = vld [vmem:[#allocation7 + $0x10] sm:$0xff]   ;;  %v1617_v8 = vld [vmem:[#allocation7 + $0x18] sm:$0xff]   ;;  %v1619_v10 = vld [vmem:[#allocation7 + $0x20] sm:$0xff]   ;;  %s340_s12 = scalar_lea.vmem [#allocation12], %s1259_s11  ;;  %s2215_s13 = scalar_lea.hbm %s2266_s7, %s1320_s29 }
  0x8a   : > { %1389 = vmatprep.subr.bf16.mxu0 %v1864_v0  ;;  %1409 = vmatprep.subr.bf16.mxu1 %v1864_v0  ;;  %v342_v11 = vld [vmem:[%s2113_s20] sm:$0xff]  ;;  %v343_v12 = vld [vmem:[%s2113_s20 + $0x8] sm:$0xff]  ;;  %s1146_s8 = sshll.u32 %s340_s12, 4  ;;  %s1133_s20 = scalar_lea.sflag [#allocation6], %s2109_s21  ;;  %s2217_s8 = int_to_ptr.vmem [resolvable:$true] %s1146_s8 }
  0x8b   : > { %346 = vst [vmem:[#allocation2 + $0x1] sm:$0xff] %v342_v11  ;;  %347 = vst [vmem:[#allocation2 + $0x9] sm:$0xff] %v343_v12  ;;  %v1620_v13 = vld [vmem:[#allocation7 + $0x68] sm:$0xff]   ;;  %v1622_v15 = vld [vmem:[#allocation7 + $0x70] sm:$0xff]   ;;  %s1780_s28 = scalar_lea.vmem %s2217_s8, 64  ;;  %s1866_s30 = smov [#allocation12]  }
  0x8c   : > { %v1621_v14 = vld [vmem:[#allocation7 + $0x28] sm:$0xff]   ;;  %v1623_v16 = vld [vmem:[#allocation7 + $0x30] sm:$0xff]   ;;  %v1624_v17 = vld [vmem:[#allocation7 + $0x78] sm:$0xff]   ;;  %p1781_p10 = scmp.ne.s32.totalorder %s2217_s8, %s1780_s28  ;;  %s1784_s9 = sshll.u32 %s1866_s30, 4  ;;  %s1785_s9 = int_to_ptr.vmem [resolvable:$false] %s1784_s9 }
  0x8d   : > { %1390 = vmatpush3.bf16.msra.mxu0 %v1612_v3  ;;  %1410 = vmatpush3.bf16.msra.mxu1 %v1613_v4  ;;  %v1625_v18 = vld [vmem:[#allocation7 + $0x38] sm:$0xff]   ;;  %v1626_v21 = vld [vmem:[#allocation7 + $0x80] sm:$0xff]   ;;  %v1627_v24 = vld [vmem:[#allocation7 + $0x88] sm:$0xff]   ;;  %s1786_s23 = scalar_lea.vmem %s1785_s9, 128  ;;  %p1787_p12 = scmp.lt.s32.totalorder %s2217_s8, %s1785_s9 }
  0x8e   : > { %1391 = vmatprep.subr.bf16.mxu0 %v1864_v0  ;;  %1411 = vmatprep.subr.bf16.mxu1 %v1864_v0  ;;  %v1628_v25 = vld [vmem:[#allocation7 + $0x90] sm:$0xff]   ;;  %v1629_v26 = vld [vmem:[#allocation7 + $0x98] sm:$0xff]   ;;  %v1630_v27 = vld [vmem:[#allocation7 + $0xa0] sm:$0xff]   ;;  %p1782_p3 = pnand %p1781_p10, %p2061_p5  ;;  %p1788_p1 = scmp.lt.s32.totalorder %s1786_s23, %s1780_s28 }
  0x8f   : > { %v1631_v28 = vld [vmem:[#allocation7 + $0xa8] sm:$0xff]   ;;  %v1632_v29 = vld [vmem:[#allocation7 + $0xb0] sm:$0xff]   ;;  %v1633_v30 = vld [vmem:[#allocation7 + $0xb8] sm:$0xff]  }
  0x90   : > { %v1634_v33 = vld [vmem:[#allocation9 + $0x40] sm:$0xff]   ;;  %v1636_v35 = vld [vmem:[#allocation9 + $0x48] sm:$0xff]   ;;  %v1638_v37 = vld [vmem:[#allocation9 + $0x50] sm:$0xff]   ;;  %p1783_p7 = pneg %p1782_p3  ;;  %p1789_p2 = por %p1788_p1, %p1787_p12 }
  0x91   : > { %1392 = vmatpush3.bf16.msra.mxu0 %v1614_v5  ;;  %1412 = vmatpush3.bf16.msra.mxu1 %v1615_v6  ;;  %v1635_v34 = vld [vmem:[#allocation9] sm:$0xff]   ;;  %v1637_v36 = vld [vmem:[#allocation9 + $0x8] sm:$0xff]   ;;  %v1639_v38 = vld [vmem:[#allocation9 + $0x10] sm:$0xff]  }
  0x92   : > { %1393 = vmatprep.subr.bf16.mxu0 %v1864_v0  ;;  %1413 = vmatprep.subr.bf16.mxu1 %v1864_v0  ;;  %v367_v19 = vld [vmem:[#allocation2 + $0x1] ss:$2 sm:$0xff]  ;;  %v348_v20 = vld [vmem:[#allocation2] ss:$2 sm:$0xff]  ;;  %v1644_v43 = vld [vmem:[#allocation9 + $0x68] sm:$0xff]   ;;  %p1790_p4 = pnand %p1789_p2, %p1783_p7 }
  0x93   : > { %v368_v22 = vpack.c.bf16 %v367_v19, %v367_v19  ;;  %v349_v23 = vpack.c.bf16 %v348_v20, %v348_v20  ;;  %v563_v31 = vld [vmem:[#allocation2 + $0x2] ss:$2 sm:$0xff]  ;;  %v1646_v45 = vld [vmem:[#allocation9 + $0x70] sm:$0xff]   ;;  %v1284_v59 = vld [vmem:[%s2261_s2] ss:$0 sm:$0xff] }
  0x94   : > { %v564_v32 = vpack.c.bf16 %v563_v31, %v563_v31  ;;  %v1640_v39 = vld [vmem:[#allocation9 + $0x58] sm:$0xff]   ;;  %v1642_v41 = vld [vmem:[#allocation9 + $0x60] sm:$0xff]   ;;  %v1645_v44 = vld [vmem:[#allocation9 + $0x28] sm:$0xff]  }
  0x95   : > { %1394 = vmatpush3.bf16.msra.mxu0 %v1616_v7  ;;  %1414 = vmatpush3.bf16.msra.mxu1 %v1617_v8  ;;  %v1641_v40 = vld [vmem:[#allocation9 + $0x18] sm:$0xff]   ;;  %v1643_v42 = vld [vmem:[#allocation9 + $0x20] sm:$0xff]   ;;  %v1647_v46 = vld [vmem:[#allocation9 + $0x30] sm:$0xff]  }
  0x96   : > { %1395 = vmatprep.subr.bf16.mxu0 %v1864_v0  ;;  %1415 = vmatprep.subr.bf16.mxu1 %v1864_v0  ;;  %v1648_v47 = vld [vmem:[#allocation9 + $0x78] sm:$0xff]   ;;  %v1650_v4 = vld [vmem:[#allocation9 + $0x80] sm:$0xff]   ;;  %v1659_v19 = vld [vmem:[#allocation10 + $0x8] sm:$0xff]  }
  0x97   : > { %v1649_v48 = vld [vmem:[#allocation9 + $0x38] sm:$0xff]   ;;  %v1654_v12 = vld [vmem:[#allocation9 + $0xa0] sm:$0xff]   ;;  %v1660_v20 = vld [vmem:[#allocation10 + $0x10] sm:$0xff]  }
  0x98   : > { %v1653_v11 = vld [vmem:[#allocation9 + $0x98] sm:$0xff]  }
  0x99   : > { %1396 = vmatpush3.bf16.msra.mxu0 %v1618_v9  ;;  %1416 = vmatpush3.bf16.msra.mxu1 %v1619_v10  ;;  %v1651_v9 = vld [vmem:[#allocation9 + $0x88] sm:$0xff]   ;;  %v1652_v10 = vld [vmem:[#allocation9 + $0x90] sm:$0xff]  }
  0x9a   : > { %1397 = vmatprep.subr.bf16.mxu0 %v1864_v0  ;;  %1417 = vmatprep.subr.bf16.mxu1 %v1864_v0 }
  0x9d   : > { %1398 = vmatpush3.bf16.msra.mxu0 %v1620_v13  ;;  %1418 = vmatpush3.bf16.msra.mxu1 %v1621_v14  ;;  %v1655_v13 = vld [vmem:[#allocation9 + $0xa8] sm:$0xff]   ;;  %v1656_v14 = vld [vmem:[#allocation9 + $0xb0] sm:$0xff]  }
  0x9e   : > { %1399 = vmatprep.subr.bf16.mxu0 %v1864_v0  ;;  %1419 = vmatprep.subr.bf16.mxu1 %v1864_v0 }
  0xa1   : > { %1400 = vmatpush3.bf16.msra.mxu0 %v1622_v15  ;;  %1420 = vmatpush3.bf16.msra.mxu1 %v1623_v16  ;;  %v1657_v15 = vld [vmem:[#allocation9 + $0xb8] sm:$0xff]  }
  0xa2   : > { %1401 = vmatprep.subr.bf16.mxu0 %v1864_v0  ;;  %1421 = vmatprep.subr.bf16.mxu1 %v1864_v0 }
  0xa5   : > { %1402 = vmatpush3.bf16.msra.mxu0 %v1624_v17  ;;  %1422 = vmatpush3.bf16.msra.mxu1 %v1625_v18  ;;  %v1658_v18 = vld [vmem:[#allocation10] sm:$0xff]  }
  0xa6   : > { %1427 = vmatprep.subr.bf16.mxu0 %v1864_v0  ;;  %1447 = vmatprep.subr.bf16.mxu1 %v1864_v0 }
  0xa8   : > { %1404 = vmatmul.mubr.bf16.vlgmr.msra.gmra.mrb[0].mxu0 %v368_v22  ;;  %1424 = vmatmul.mubr.bf16.vlgmr.msra.gmra.mrb[0].mxu1 %v349_v23  ;;  %v1662_v22 = vld [vmem:[#allocation10 + $0x20] sm:$0xff]   ;;  %v1663_v23 = vld [vmem:[#allocation10 + $0x28] sm:$0xff]  }
  0xa9   : > { %1428 = vmatpush3.bf16.msra.mxu0 %v1626_v21  ;;  %1443 = vmatprep.mubr.msk.bf16.mxu0 %vm1865_vm0, %v1864_v0  ;;  %v1661_v21 = vld [vmem:[#allocation10 + $0x18] sm:$0xff]  }
  0xaa   : > { %1429 = vmatprep.subr.bf16.mxu0 %v1864_v0  ;;  %1463 = vmatprep.mubr.msk.bf16.mxu1 %vm1865_vm0, %v1864_v0 }
  0xab   : > { %1448 = vmatpush3.bf16.msra.mxu1 %v1634_v33 }
  0xac   : > { %1449 = vmatprep.subr.bf16.mxu1 %v1864_v0 }
  0xad   : > { %1430 = vmatpush3.bf16.msra.mxu0 %v1627_v24  ;;  %v1664_v24 = vld [vmem:[#allocation10 + $0x30] sm:$0xff]  }
  0xae   : > { %1431 = vmatprep.subr.bf16.mxu0 %v1864_v0 }
  0xaf   : > { %1450 = vmatpush3.bf16.msra.mxu1 %v1636_v35 }
  0xb0   : > { %1451 = vmatprep.subr.bf16.mxu1 %v1864_v0 }
  0xb1   : > { %1432 = vmatpush3.bf16.msra.mxu0 %v1628_v25  ;;  %v1665_v25 = vld [vmem:[#allocation10 + $0x38] sm:$0xff]  }
  0xb2   : > { %1433 = vmatprep.subr.bf16.mxu0 %v1864_v0 }
  0xb3   : > { %1452 = vmatpush3.bf16.msra.mxu1 %v1638_v37 }
  0xb4   : > { %1453 = vmatprep.subr.bf16.mxu1 %v1864_v0 }
  0xb5   : > { %1434 = vmatpush3.bf16.msra.mxu0 %v1629_v26 }
  0xb6   : > { %1435 = vmatprep.subr.bf16.mxu0 %v1864_v0 }
  0xb7   : > { %1454 = vmatpush3.bf16.msra.mxu1 %v1640_v39 }
  0xb8   : > { %1455 = vmatprep.subr.bf16.mxu1 %v1864_v0 }
  0xb9   : > { %1436 = vmatpush3.bf16.msra.mxu0 %v1630_v27 }
  0xba   : > { %1437 = vmatprep.subr.bf16.mxu0 %v1864_v0 }
  0xbb   : > { %1456 = vmatpush3.bf16.msra.mxu1 %v1642_v41 }
  0xbc   : > { %1457 = vmatprep.subr.bf16.mxu1 %v1864_v0 }
  0xbd   : > { %1438 = vmatpush3.bf16.msra.mxu0 %v1631_v28 }
  0xbe   : > { %1439 = vmatprep.subr.bf16.mxu0 %v1864_v0 }
  0xbf   : > { %1458 = vmatpush3.bf16.msra.mxu1 %v1644_v43 }
  0xc0   : > { %1459 = vmatprep.subr.bf16.mxu1 %v1864_v0 }
  0xc1   : > { %1440 = vmatpush3.bf16.msra.mxu0 %v1632_v29 }
  0xc2   : > { %1441 = vmatprep.subr.bf16.mxu0 %v1864_v0 }
  0xc3   : > { %1460 = vmatpush3.bf16.msra.mxu1 %v1646_v45 }
  0xc4   : > { %1461 = vmatprep.subr.bf16.mxu1 %v1864_v0 }
  0xc5   : > { %1442 = vmatpush3.bf16.msra.mxu0 %v1633_v30 }
  0xc6   : > { %1467 = vmatprep.subr.bf16.mxu0 %v1864_v0 }
  0xc7   : > { %1462 = vmatpush3.bf16.msra.mxu1 %v1648_v47 }
  0xc8   : > { %1444 = vmatmul.mubr.bf16.vlgmr.msra.gmra.mrb[4].mxu0 %v564_v32  ;;  %1487 = vmatprep.subr.bf16.mxu1 %v1864_v0 }
  0xc9   : > { %1483 = vmatprep.mubr.msk.bf16.mxu0 %vm1865_vm0, %v1864_v0  ;;  %1468 = vmatpush3.bf16.msra.mxu0 %v1635_v34 }
  0xca   : > { %1469 = vmatprep.subr.bf16.mxu0 %v1864_v0 }
  0xcd   : > { %1470 = vmatpush3.bf16.msra.mxu0 %v1637_v36  ;;  %v1309_v36 = vld [vmem:[%s2263_s4] ss:$0 sm:$0xff] }
  0xce   : > { %1471 = vmatprep.subr.bf16.mxu0 %v1864_v0 }
  0xd1   : > { %1472 = vmatpush3.bf16.msra.mxu0 %v1639_v38 }
  0xd2   : > { %1473 = vmatprep.subr.bf16.mxu0 %v1864_v0 }
  0xd5   : > { %1474 = vmatpush3.bf16.msra.mxu0 %v1641_v40 }
  0xd6   : > { %1475 = vmatprep.subr.bf16.mxu0 %v1864_v0 }
  0xd9   : > { %1476 = vmatpush3.bf16.msra.mxu0 %v1643_v42 }
  0xda   : > { %1477 = vmatprep.subr.bf16.mxu0 %v1864_v0 }
  0xdd   : > { %1478 = vmatpush3.bf16.msra.mxu0 %v1645_v44  ;;  %v1310_v44 = vld [vmem:[%s2265_s6] ss:$0 sm:$0xff] }
  0xde   : > { %1479 = vmatprep.subr.bf16.mxu0 %v1864_v0 }
  0xe1   : > { %1480 = vmatpush3.bf16.msra.mxu0 %v1647_v46 }
  0xe2   : > { %1481 = vmatprep.subr.bf16.mxu0 %v1864_v0 }
  0xe5   : > { %1482 = vmatpush3.bf16.msra.mxu0 %v1649_v48 }
  0xe6   : > { %1507 = vmatprep.subr.bf16.mxu0 %v1864_v0 }
 0x17b   : > { %v468_v49 = vpop.f32.mrb[0].mxu0  ;;  %v556_v51 = vpop.f32.mrb[0].mxu1 }
 0x17c   : > { %v1405_v50 = vpop.f32.mrb[1].mxu0  ;;  %v557_v52 = vadd.f32 %v556_v51, %v468_v49  ;;  %v1425_v54 = vpop.f32.mrb[1].mxu1 }
 0x17d   : > { %v471_v53 = vpop.f32.mrb[2].mxu0  ;;  %v559_v56 = vpop.f32.mrb[2].mxu1 }
 0x17e   : > { %v1406_v55 = vpop.f32.mrb[3].mxu0  ;;  %v1426_v57 = vpop.f32.mrb[3].mxu1 }
 0x19b   : > { %v664_v58 = vpop.f32.mrb[4].mxu0 }
 0x19c   : > { %v670_v60 = vadd.f32 %v664_v58, %v557_v52  ;;  %v1445_v61 = vpop.f32.mrb[5].mxu0 }
 0x19d   : > { %v667_v62 = vpop.f32.mrb[6].mxu0 }
 0x19e   : > { %v678_v63 = vadd.f32 %v1284_v59, %v670_v60  ;;  %v1446_v1 = vpop.f32.mrb[7].mxu0 }
 0x1a0   : > { %vm679_vm1 = vcmp.gt.f32.partialorder %v678_v63, 0.0  ;;  %v680_v2 = vmul.f32 0.2, %v678_v63 }
 0x1a2   : > { %v681_v3 = vsel %vm679_vm1, %v678_v63, %v680_v2 }
 0x1a3   : > { %684 = vst [vmem:[#allocation3 + $0x1] sm:$0xff] %v681_v3 }
 0x1aa   : > { %v704_v5 = vld [vmem:[#allocation3 + $0x1] ss:$2 sm:$0xf]  ;;  %v685_v6 = vld [vmem:[#allocation3] ss:$2 sm:$0xf] }
 0x1ab   : > { %v705_v7 = vpack.c.bf16 %v704_v5, %v704_v5  ;;  %v686_v8 = vpack.c.bf16 %v685_v6, %v685_v6  ;;  %v900_v16 = vld [vmem:[#allocation3 + $0x2] ss:$2 sm:$0xf] }
 0x1ac   : > { %v901_v17 = vpack.c.bf16 %v900_v16, %v900_v16 }
 0x1ad   : > { %1464 = vmatmul.mubr.bf16.vlgmr.msra.gmra.mrb[4].mxu1 %v705_v7  ;;  %1484 = vmatmul.mubr.bf16.vlgmr.msra.gmra.mrb[8].mxu0 %v686_v8 }
 0x1ae   : > { %1488 = vmatpush3.bf16.msra.mxu1 %v1650_v4  ;;  %1503 = vmatprep.mubr.msk.bf16.mxu1 %vm1865_vm0, %v1864_v0 }
 0x1af   : > { %1489 = vmatprep.subr.bf16.mxu1 %v1864_v0  ;;  %1523 = vmatprep.mubr.msk.bf16.mxu0 %vm1865_vm0, %v1864_v0 }
 0x1b0   : > { %1508 = vmatpush3.bf16.msra.mxu0 %v1658_v18 }
 0x1b1   : > { %1509 = vmatprep.subr.bf16.mxu0 %v1864_v0 }
 0x1b2   : > { %1490 = vmatpush3.bf16.msra.mxu1 %v1651_v9 }
 0x1b3   : > { %1491 = vmatprep.subr.bf16.mxu1 %v1864_v0 }
 0x1b4   : > { %1510 = vmatpush3.bf16.msra.mxu0 %v1659_v19 }
 0x1b5   : > { %1511 = vmatprep.subr.bf16.mxu0 %v1864_v0 }
 0x1b6   : > { %1492 = vmatpush3.bf16.msra.mxu1 %v1652_v10 }
 0x1b7   : > { %1493 = vmatprep.subr.bf16.mxu1 %v1864_v0 }
 0x1b8   : > { %1512 = vmatpush3.bf16.msra.mxu0 %v1660_v20 }
 0x1b9   : > { %1513 = vmatprep.subr.bf16.mxu0 %v1864_v0 }
 0x1ba   : > { %1494 = vmatpush3.bf16.msra.mxu1 %v1653_v11 }
 0x1bb   : > { %1495 = vmatprep.subr.bf16.mxu1 %v1864_v0 }
 0x1bc   : > { %1514 = vmatpush3.bf16.msra.mxu0 %v1661_v21 }
 0x1bd   : > { %1515 = vmatprep.subr.bf16.mxu0 %v1864_v0 }
 0x1be   : > { %1496 = vmatpush3.bf16.msra.mxu1 %v1654_v12 }
 0x1bf   : > { %1497 = vmatprep.subr.bf16.mxu1 %v1864_v0 }
 0x1c0   : > { %1516 = vmatpush3.bf16.msra.mxu0 %v1662_v22 }
 0x1c1   : > { %1517 = vmatprep.subr.bf16.mxu0 %v1864_v0 }
 0x1c2   : > { %1498 = vmatpush3.bf16.msra.mxu1 %v1655_v13 }
 0x1c3   : > { %1499 = vmatprep.subr.bf16.mxu1 %v1864_v0 }
 0x1c4   : > { %1518 = vmatpush3.bf16.msra.mxu0 %v1663_v23 }
 0x1c5   : > { %1519 = vmatprep.subr.bf16.mxu0 %v1864_v0 }
 0x1c6   : > { %1500 = vmatpush3.bf16.msra.mxu1 %v1656_v14 }
 0x1c7   : > { %1501 = vmatprep.subr.bf16.mxu1 %v1864_v0 }
 0x1c8   : > { %1520 = vmatpush3.bf16.msra.mxu0 %v1664_v24 }
 0x1c9   : > { %1521 = vmatprep.subr.bf16.mxu0 %v1864_v0 }
 0x1ca   : > { %1502 = vmatpush3.bf16.msra.mxu1 %v1657_v15 }
 0x1cc   : > { %1522 = vmatpush3.bf16.msra.mxu0 %v1665_v25 }
 0x1cd   : > { %1504 = vmatmul.mubr.bf16.vlgmr.msra.gmra.mrb[8].mxu1 %v901_v17 }
 0x280   : > { %v805_v26 = vpop.f32.mrb[4].mxu1  ;;  %v893_v27 = vpop.f32.mrb[8].mxu0 }
 0x281   : > { %v894_v28 = vadd.f32 %v893_v27, %v805_v26  ;;  %v1465_v29 = vpop.f32.mrb[5].mxu1  ;;  %v1485_v30 = vpop.f32.mrb[9].mxu0 }
 0x282   : > { %v808_v31 = vpop.f32.mrb[6].mxu1  ;;  %v896_v32 = vpop.f32.mrb[10].mxu0 }
 0x283   : > { %v1466_v33 = vpop.f32.mrb[7].mxu1  ;;  %v1486_v34 = vpop.f32.mrb[11].mxu0 }
 0x2a0   : > { %v1001_v35 = vpop.f32.mrb[8].mxu1 }
 0x2a1   : > { %v1007_v37 = vadd.f32 %v1001_v35, %v894_v28  ;;  %v1505_v0 = vpop.f32.mrb[9].mxu1 }
 0x2a2   : > { %v1004_v38 = vpop.f32.mrb[10].mxu1 }
 0x2a3   : > { %v1015_v39 = vadd.f32 %v1309_v36, %v1007_v37  ;;  %v1506_v40 = vpop.f32.mrb[11].mxu1 }
 0x2a5   : > { %vm1016_vm2 = vcmp.gt.f32.partialorder %v1015_v39, 0.0  ;;  %v1017_v41 = vmul.f32 0.2, %v1015_v39 }
 0x2a7   : > { %v1018_v42 = vsel %vm1016_vm2, %v1015_v39, %v1017_v41 }
 0x2a8   : > { %v1019_v43 = vpack.c.bf16 %v1018_v42, %v1018_v42 }
 0x2aa   : > { %1524 = vmatmul.mubr.bf16.vlgmr.msra.gmra.mrb[12].mxu0 %v1019_v43 }
 0x37d   : > { %v1125_v45 = vpop.f32.mrb[12].mxu0 }
 0x37e   : > { %v1126_v46 = vadd.f32 %v1310_v44, %v1125_v45  ;;  %v1525_v47 = vpop.f32.mrb[13].mxu0 }
 0x37f   : > { %v1128_v48 = vpop.f32.mrb[14].mxu0 }
 0x380   : > { %1131 = vst [vmem:[%s340_s12] sm:$0xf] %v1126_v46  ;;  %v1526_v49 = vpop.f32.mrb[15].mxu0 }
 0x381   : > { %1793 = shalt.err (!%p1790_p4)
}
 0x382   : > { %s1794_s21 = scalar_lea.hbm %s2215_s13, 64  ;;  %s1798_s14 = scalar_lea.hbm %s2266_s7, 128 }
 0x383   : > { %p1795_p9 = scmp.ne.s32.totalorder %s2215_s13, %s1794_s21  ;;  %p1799_p8 = scmp.lt.u32.totalorder %s2215_s13, %s2266_s7 }
 0x384   : > { %p1800_p13 = scmp.lt.u32.totalorder %s1798_s14, %s1794_s21  ;;  %p1802_p10 = scmp.lt.u32.totalorder %s1794_s21, %s2215_s13 }
 0x385   : > { %p1796_p0 = pnand %p1795_p9, %p2061_p5 }
 0x386   : > { %p1801_p6 = por %p1800_p13, %p1799_p8 }
 0x387   : > { %p1797_p11 = pneg %p1796_p0 }
 0x388   : > { %p1803_p3 = por %p1802_p10, %p1801_p6 }
 0x38a   : > { %p1804_p7 = pnand %p1803_p3, %p1797_p11 }
 0x38c   : > { %1807 = shalt.err (!%p1804_p7)
}
 0x38d   : > { %1541 = dma.vmem_to_hbm [thread:$0]  (%p2061_p5), %s2217_s8, 64, %s2215_s13, %s1133_s20  }
 0x38e PF: > { %s2286_s12 = sld [smem:[#allocation17_spill]]  ;;  %s1158_s17 = sand.u32 1, %s1842_s24  }
 0x38f   : > { %p2288_p1 = scmp.ge.s32.totalorder %s1854_s27, 2  ;;  %s1159_s16 = scalar_lea.sflag [#allocation6], %s1158_s17 }
 0x394   : > { %p2287_p12 = scmp.ne.s32.totalorder %s2286_s12, 0 }
 0x396   : > { %p1558_p2 = pnand %p2288_p1, %p2287_p12 }
 0x398   : > { %1837 = dma.done.wait (!%p1558_p2), %s1159_s16, 64  }
 0x399   : > { %1839 = vsyncadd (!%p1558_p2), %s1159_s16, 4294967232  ;;  %p22_p4 = scmp.ge.s32.totalorder %s2047_s22, 4   ;;  %s2289_s24 = smov %s1846_s25 }
 0x39a   : > { %s2290_s25 = smov %s1850_s26  ;;  %s2291_s26 = smov %s2057_s18 }
 0x39b   : > { %s2292_s27 = smov %s2047_s22  ;;  %24 = sbr.rel (!%p22_p4) target bundleno = 7 (0x7), region = 113 }
 0x3a2   :  { %1164 = vsyncpa [#allocation5], 1 }
 0x3a3   :  { %1166 = vsyncpa [#allocation5 + $0x1], 1 }
 0x3a4   :  { %1167 = vsyncpa [#allocation8], 1 }
 0x3a5   :  { %1168 = vsyncpa [#allocation11], 1 }
 0x3a6   :  { %1169 = vsyncpa [#allocation6], 1 }
 0x3a7   :  { %1171 = vsyncpa [#allocation6 + $0x1], 1 }

</bundles_post_ra>
